<compile_context>
chip_gen: v7x
topology: tpu7x:2x2x1
jax: 0.10.0
libtpu: 0.0.40
codegen_flags: <defaults>
</compile_context>

<pallas_src>
import math

import jax
import jax.numpy as jnp
from jax.experimental import pallas as pl
from jax.experimental.pallas import tpu as pltpu


def _apply_noise_kernel(x_ref, noise_ref, w_ref, o_ref):
    # Pure VPU streaming op: out = x + w * noise.
    # w_ref is a single lane-dense row (1, LAST) broadcast over the sublanes.
    o_ref[...] = x_ref[...] + w_ref[...] * noise_ref[...]


def _round_up(a, b):
    return (a + b - 1) // b * b


def apply_noise(x, weight, noise, *, target_block_bytes=2 * 1024 * 1024):
    """out = x + weight * noise (weight broadcasts along the last axis, as in the reference).

    x, noise: (N, C, H, W); weight: (C,); requires C == W (reference broadcast).
    """
    N, C, H, W = x.shape
    assert weight.shape == (C,), "weight must have shape (channels,)"
    assert C == W, "reference code broadcasts weight along the last (W) axis"
    assert noise.shape == x.shape

    dtype = x.dtype
    itemsize = jnp.dtype(dtype).itemsize
    total = N * C * H * W

    # Lane-dense trailing dim: multiple of 128 (lanes) and of W (weight period),
    # grown to at least 1024 lanes for wide unmasked loads/stores.
    last = (W * 128) // math.gcd(W, 128)  # lcm(W, 128)
    while last < 1024:
        last *= 2

    # Rows of the flattened (rows, last) view needed to cover the tensor.
    rows_needed = pl.cdiv(total, last)

    # Row tile: multiple of 8 sublanes, sized so one streamed block is roughly
    # target_block_bytes, but never larger than the (rounded-up) problem itself.
    tr = max(8, (target_block_bytes // (last * itemsize)) // 8 * 8)
    tr = min(tr, _round_up(rows_needed, 8))

    grid = (pl.cdiv(rows_needed, tr),)
    rows_pad = grid[0] * tr
    total_pad = rows_pad * last

    x_flat = x.reshape(-1)
    n_flat = noise.reshape(-1)
    if total_pad != total:
        pad = total_pad - total
        x_flat = jnp.pad(x_flat, (0, pad))
        n_flat = jnp.pad(n_flat, (0, pad))
    x2 = x_flat.reshape(rows_pad, last)
    n2 = n_flat.reshape(rows_pad, last)

    # Flat index f maps to weight index f % W; since last % W == 0 the weight
    # pattern in every lane-dense row is just `weight` tiled last // W times.
    w2 = jnp.tile(weight.astype(dtype), last // W).reshape(1, last)

    out = pl.pallas_call(
        _apply_noise_kernel,
        out_shape=jax.ShapeDtypeStruct((rows_pad, last), dtype),
        grid_spec=pl.GridSpec(
            grid=grid,
            in_specs=[
                pl.BlockSpec((tr, last), lambda i: (i, 0)),
                pl.BlockSpec((tr, last), lambda i: (i, 0)),
                pl.BlockSpec((1, last), lambda i: (0, 0)),
            ],
            out_specs=pl.BlockSpec((tr, last), lambda i: (i, 0)),
        ),
        compiler_params=pltpu.CompilerParams(
            dimension_semantics=("parallel",),
            # 6 double-buffered ~2 MiB blocks ≈ 12 MiB; 32 MiB gives headroom on
            # v5e (16 MiB scoped default) and stays under v7x's 64 MiB physical.
            vmem_limit_bytes=32 * 1024 * 1024,
        ),
    )(x2, n2, w2)

    out_flat = out.reshape(-1)
    if total_pad != total:
        out_flat = out_flat[:total]
    return out_flat.reshape(N, C, H, W)


if __name__ == "__main__":
    key = jax.random.PRNGKey(0)
    kx, kn = jax.random.split(key)

    N, C, H, W = 2, 16, 16, 16  # channels == W so the reference broadcast is valid
    x = jax.random.normal(kx, (N, C, H, W), dtype=jnp.float32)
    noise = jax.random.normal(kn, (N, C, H, W), dtype=jnp.float32)

    # Parameter init per module __init__: weight = zeros(channels).
    weight_init = jnp.zeros((C,), dtype=jnp.float32)
    out0 = apply_noise(x, weight_init, noise)
    jax.block_until_ready(out0)
    ref0 = x + weight_init * noise  # same broadcasting as the PyTorch code
    assert out0.shape == x.shape
    assert jnp.allclose(out0, ref0, atol=1e-6), "mismatch with zero weight"

    # Non-trivial weight exercises the tiled lane-dense weight row.
    weight_nz = (jnp.arange(C, dtype=jnp.float32) - C / 2.0) * 0.1
    out1 = apply_noise(x, weight_nz, noise)
    jax.block_until_ready(out1)
    ref1 = x + weight_nz * noise
    assert jnp.allclose(out1, ref1, atol=1e-5), "mismatch with nonzero weight"

    # Shape whose flattened size is not a multiple of the lane-dense row width
    # (exercises the zero-padded tail path instead of a whole-array block).
    x3 = jax.random.normal(kx, (N, C, 3, W), dtype=jnp.float32)
    n3 = jax.random.normal(kn, (N, C, 3, W), dtype=jnp.float32)
    out3 = apply_noise(x3, weight_nz, n3)
    jax.block_until_ready(out3)
    assert jnp.allclose(out3, x3 + weight_nz * n3, atol=1e-5), "mismatch with padded tail"

    print("KERNEL_OK")
</pallas_src>

<mosaic_0001>
module attributes {stable_mosaic.version = 11 : i64} {
  func.func @_apply_noise_kernel(%arg0: i32, %arg1: memref<8x1024xf32, #tpu.memory_space<vmem>>, %arg2: memref<8x1024xf32, #tpu.memory_space<vmem>>, %arg3: memref<1x1024xf32, #tpu.memory_space<vmem>>, %arg4: memref<8x1024xf32, #tpu.memory_space<vmem>>) attributes {dimension_semantics = [#tpu.dimension_semantics<parallel>], iteration_bounds = array<i64: 1>, scalar_prefetch = 0 : i64, scratch_operands = 0 : i64, tpu.core_type = #tpu.core_type<tc>, window_params = [{transform_indices = @transform_0, window_bounds = array<i64: 8, 1024>}, {transform_indices = @transform_1, window_bounds = array<i64: 8, 1024>}, {pipeline_mode = #tpu.pipeline_mode<synchronous>, transform_indices = @transform_2, window_bounds = array<i64: 1, 1024>}, {transform_indices = @transform_3, window_bounds = array<i64: 8, 1024>}]} {
    %c0 = arith.constant 0 : index
    %c0_0 = arith.constant 0 : index
    %0 = vector.load %arg1[%c0, %c0_0] : memref<8x1024xf32, #tpu.memory_space<vmem>>, vector<8x1024xf32>
    %c0_1 = arith.constant 0 : index
    %c0_2 = arith.constant 0 : index
    %1 = vector.load %arg3[%c0_1, %c0_2] : memref<1x1024xf32, #tpu.memory_space<vmem>>, vector<1x1024xf32>
    %c0_3 = arith.constant 0 : index
    %c0_4 = arith.constant 0 : index
    %2 = vector.load %arg2[%c0_3, %c0_4] : memref<8x1024xf32, #tpu.memory_space<vmem>>, vector<8x1024xf32>
    %3 = vector.broadcast %1 : vector<1x1024xf32> to vector<8x1024xf32>
    %4 = arith.mulf %3, %2 : vector<8x1024xf32>
    %5 = arith.addf %0, %4 : vector<8x1024xf32>
    %c0_5 = arith.constant 0 : index
    %c0_6 = arith.constant 0 : index
    %6 = vector.load %arg4[%c0_5, %c0_6] : memref<8x1024xf32, #tpu.memory_space<vmem>>, vector<8x1024xf32>
    tpu.vector_store %arg4[%c0_5, %c0_6], %5 {strides = array<i32>} : memref<8x1024xf32, #tpu.memory_space<vmem>>, vector<8x1024xf32>,
    return
  }
  func.func @transform_0(%arg0: i32) -> (i32, i32) {
    %c0_i32 = arith.constant 0 : i32
    %c0_i32_0 = arith.constant 0 : i32
    return %arg0, %c0_i32 : i32, i32
  }
  func.func @transform_1(%arg0: i32) -> (i32, i32) {
    %c0_i32 = arith.constant 0 : i32
    %c0_i32_0 = arith.constant 0 : i32
    return %arg0, %c0_i32 : i32, i32
  }
  func.func @transform_2(%arg0: i32) -> (i32, i32) {
    %c0_i32 = arith.constant 0 : i32
    %c0_i32_0 = arith.constant 0 : i32
    %c0_i32_1 = arith.constant 0 : i32
    return %c0_i32, %c0_i32_0 : i32, i32
  }
  func.func @transform_3(%arg0: i32) -> (i32, i32) {
    %c0_i32 = arith.constant 0 : i32
    %c0_i32_0 = arith.constant 0 : i32
    return %arg0, %c0_i32 : i32, i32
  }
}

</mosaic_0001>

<bundles_post_ra>
// kernel: tpu_custom_call.1
= control target key start
LH: loop header
LB: loop body
LE: loop exit
PB: predicated region body
PF: predicated region fallthrough
CT: control target
= control target key end

     0   :  { %8 = vsyncpa [#allocation3], 0  ;;  %s318_s0 = inlined_call_operand.hbm [shape: f32[8,1024], index: 0, kind: input, shape index: {}]   ;;  %s319_s1 = inlined_call_operand.hbm [shape: f32[8,1024], index: 1, kind: input, shape index: {}]   ;;  %s320_s2 = inlined_call_operand.hbm [shape: f32[1,1024], index: 2, kind: input, shape index: {}]   ;;  %s321_s3 = inlined_call_operand.hbm [shape: f32[8,1024], index: 3, kind: output, shape index: {}]  }
   0x1   :  { %9 = vsyncpa [#allocation6], 0 }
   0x2   :  { %10 = vsyncpa [#allocation4], 0  ;;  %s246_s12 = smov [#allocation5]   ;;  %s247_s14 = smov [#allocation2]  }
   0x3   :  { %s27_s13 = sshll.u32 %s246_s12, 4  ;;  %s17_s15 = sshll.u32 %s247_s14, 4  ;;  %s28_s13 = int_to_ptr.vmem [resolvable:$true] %s27_s13  ;;  %s18_s15 = int_to_ptr.vmem [resolvable:$true] %s17_s15 }
   0x4   :  { %s152_s18 = scalar_lea.hbm %s319_s1, 1024 }
   0x5   :  { %p153_p0 = scmp.ne.s32.totalorder %s319_s1, %s152_s18  ;;  %p156_p1 = scmp.lt.u32.totalorder %s152_s18, %s319_s1 }
   0x7   :  { %p158_p2 = pnand %p156_p1, %p153_p0 }
   0x9   :  { %161 = shalt.err (!%p158_p2)
}
   0xa   :  { %s162_s23 = scalar_lea.vmem %s28_s13, 1024  ;;  %p167_p4 = scmp.lt.s32.totalorder %s28_s13, %s28_s13 }
   0xb   :  { %p163_p3 = scmp.ne.s32.totalorder %s28_s13, %s162_s23  ;;  %p168_p5 = scmp.lt.s32.totalorder %s162_s23, %s162_s23 }
   0xd   :  { %p169_p6 = por %p168_p5, %p167_p4 }
   0xf   :  { %p170_p7 = pnand %p169_p6, %p163_p3 }
  0x11   :  { %173 = shalt.err (!%p170_p7)
}
  0x12   :  { %30 = dma.hbm_to_vmem [thread:$0]  %s319_s1, 1024, %s28_s13, [#allocation6]  }
  0x13   :  { %s174_s28 = scalar_lea.hbm %s318_s0, 1024 }
  0x14   :  { %p175_p8 = scmp.ne.s32.totalorder %s318_s0, %s174_s28  ;;  %p178_p9 = scmp.lt.u32.totalorder %s174_s28, %s318_s0 }
  0x16   :  { %p180_p10 = pnand %p178_p9, %p175_p8 }
  0x18   :  { %183 = shalt.err (!%p180_p10)
}
  0x19   :  { %s184_s6 = scalar_lea.vmem %s18_s15, 1024  ;;  %p189_p12 = scmp.lt.s32.totalorder %s18_s15, %s18_s15 }
  0x1a   :  { %p185_p11 = scmp.ne.s32.totalorder %s18_s15, %s184_s6  ;;  %p190_p13 = scmp.lt.s32.totalorder %s184_s6, %s184_s6 }
  0x1c   :  { %p191_p0 = por %p190_p13, %p189_p12 }
  0x1e   :  { %p192_p1 = pnand %p191_p0, %p185_p11 }
  0x20   :  { %195 = shalt.err (!%p192_p1)
}
  0x21   :  { %20 = dma.hbm_to_vmem [thread:$0]  %s318_s0, 1024, %s18_s15, [#allocation3]  }
  0x22   :  { %s248_s8 = smov [#allocation7]   ;;  %s196_s12 = scalar_lea.hbm %s320_s2, 128 }
  0x23   :  { %s37_s9 = sshll.u32 %s248_s8, 4  ;;  %p197_p2 = scmp.ne.s32.totalorder %s320_s2, %s196_s12  ;;  %s38_s9 = int_to_ptr.vmem [resolvable:$true] %s37_s9 }
  0x24   :  { %p200_p3 = scmp.lt.u32.totalorder %s196_s12, %s320_s2 }
  0x26   :  { %p202_p4 = pnand %p200_p3, %p197_p2 }
  0x28   :  { %205 = shalt.err (!%p202_p4)
}
  0x29   :  { %s206_s18 = scalar_lea.vmem %s38_s9, 128  ;;  %p211_p6 = scmp.lt.s32.totalorder %s38_s9, %s38_s9 }
  0x2a   :  { %p207_p5 = scmp.ne.s32.totalorder %s38_s9, %s206_s18  ;;  %p212_p7 = scmp.lt.s32.totalorder %s206_s18, %s206_s18 }
  0x2c   :  { %p213_p8 = por %p212_p7, %p211_p6 }
  0x2e   :  { %p214_p9 = pnand %p213_p8, %p207_p5 }
  0x30   :  { %217 = shalt.err (!%p214_p9)
}
  0x31   :  { %40 = dma.hbm_to_vmem [thread:$0]  %s320_s2, 128, %s38_s9, [#allocation6]  }
  0x32   :  { %240 = dma.done.wait [#allocation3], 1024  }
  0x33   :  { %241 = vsyncadd [#allocation3], 4294966272 }
  0x34   :  { %242 = dma.done.wait [#allocation6], 1152  }
  0x35   :  { %243 = vsyncadd [#allocation6], 4294966144  ;;  %v68_v0 = vlaneseq  ;;  %v50_v10 = vld [vmem:[#allocation2] sm:$0xff]  ;;  %v51_v14 = vld [vmem:[#allocation2 + $0x8] sm:$0xff]  ;;  %s249_s2 = smov [#allocation8]  }
  0x36   :  { %v58_v11 = vld [vmem:[#allocation7] sm:$0xff]  ;;  %v60_v15 = vld [vmem:[#allocation5 + $0x8] sm:$0xff]  ;;  %v52_v17 = vld [vmem:[#allocation2 + $0x10] sm:$0xff]  ;;  %s138_s19 = sshll.u32 %s249_s2, 4  ;;  %s139_s19 = int_to_ptr.vmem [resolvable:$true] %s138_s19 }
  0x37   :  { %v69_v1 = vshrl.u32 %v68_v0, 7  ;;  %v59_v12 = vld [vmem:[#allocation5] sm:$0xff]  ;;  %v61_v20 = vld [vmem:[#allocation5 + $0x10] sm:$0xff]  ;;  %v53_v21 = vld [vmem:[#allocation2 + $0x18] sm:$0xff]  ;;  %s218_s20 = scalar_lea.vmem %s139_s19, 1024  ;;  %p223_p11 = scmp.lt.s32.totalorder %s139_s19, %s139_s19 }
  0x38   :  { %v62_v22 = vld [vmem:[#allocation5 + $0x18] sm:$0xff]  ;;  %v54_v31 = vld [vmem:[#allocation2 + $0x20] sm:$0xff]  ;;  %v55_v34 = vld [vmem:[#allocation2 + $0x28] sm:$0xff]  ;;  %p219_p10 = scmp.ne.s32.totalorder %s139_s19, %s218_s20  ;;  %p224_p12 = scmp.lt.s32.totalorder %s218_s20, %s218_s20 }
  0x39   :  { %v70_v2 = vsub.s32 0, %v69_v1  ;;  %v74_v3 = vsub.s32 1, %v69_v1  ;;  %v78_v4 = vsub.s32 2, %v69_v1  ;;  %v82_v5 = vsub.s32 3, %v69_v1  ;;  %v63_v32 = vld [vmem:[#allocation5 + $0x20] sm:$0xff]  ;;  %v64_v35 = vld [vmem:[#allocation5 + $0x28] sm:$0xff] }
  0x3a   :  { %v86_v6 = vsub.s32 4, %v69_v1  ;;  %v90_v7 = vsub.s32 5, %v69_v1  ;;  %v94_v8 = vsub.s32 6, %v69_v1  ;;  %v98_v9 = vsub.s32 7, %v69_v1  ;;  %v65_v36 = vld [vmem:[#allocation5 + $0x30] sm:$0xff]  ;;  %v57_v42 = vld [vmem:[#allocation2 + $0x38] sm:$0xff]  ;;  %p225_p13 = por %p224_p12, %p223_p11 }
  0x3b   :  { %v71_v13 = vrot.slane %v58_v11, %v70_v2  ;;  %v75_v16 = vrot.slane %v58_v11, %v74_v3  ;;  %v79_v18 = vrot.slane %v58_v11, %v78_v4  ;;  %v83_v19 = vrot.slane %v58_v11, %v82_v5  ;;  %v56_v41 = vld [vmem:[#allocation2 + $0x30] sm:$0xff]  ;;  %v66_v43 = vld [vmem:[#allocation5 + $0x38] sm:$0xff] }
  0x3c   :  { %v87_v23 = vrot.slane %v58_v11, %v86_v6  ;;  %v91_v24 = vrot.slane %v58_v11, %v90_v7  ;;  %v95_v25 = vrot.slane %v58_v11, %v94_v8  ;;  %v99_v26 = vrot.slane %v58_v11, %v98_v9  ;;  %p226_p0 = pnand %p225_p13, %p219_p10 }
  0x3d   :  { %v108_v27 = vmul.f32 %v71_v13, %v59_v12  ;;  %v109_v28 = vmul.f32 %v75_v16, %v60_v15  ;;  %v110_v29 = vmul.f32 %v79_v18, %v61_v20  ;;  %v111_v30 = vmul.f32 %v83_v19, %v62_v22 }
  0x3e   :  { %v112_v33 = vmul.f32 %v87_v23, %v63_v32  ;;  %v113_v45 = vmul.f32 %v91_v24, %v64_v35  ;;  %v114_v46 = vmul.f32 %v95_v25, %v65_v36  ;;  %v115_v47 = vmul.f32 %v99_v26, %v66_v43 }
  0x3f   :  { %v116_v37 = vadd.f32 %v108_v27, %v50_v10  ;;  %v117_v38 = vadd.f32 %v109_v28, %v51_v14  ;;  %v118_v39 = vadd.f32 %v110_v29, %v52_v17  ;;  %v119_v40 = vadd.f32 %v111_v30, %v53_v21 }
  0x40   :  { %v120_v44 = vadd.f32 %v112_v33, %v54_v31  ;;  %v121_v48 = vadd.f32 %v113_v45, %v55_v34  ;;  %v122_v49 = vadd.f32 %v114_v46, %v56_v41  ;;  %v123_v50 = vadd.f32 %v115_v47, %v57_v42 }
  0x41   :  { %124 = vst [vmem:[#allocation8] sm:$0xff] %v116_v37  ;;  %125 = vst [vmem:[#allocation8 + $0x8] sm:$0xff] %v117_v38 }
  0x42   :  { %126 = vst [vmem:[#allocation8 + $0x10] sm:$0xff] %v118_v39  ;;  %127 = vst [vmem:[#allocation8 + $0x18] sm:$0xff] %v119_v40 }
  0x43   :  { %128 = vst [vmem:[#allocation8 + $0x20] sm:$0xff] %v120_v44  ;;  %129 = vst [vmem:[#allocation8 + $0x28] sm:$0xff] %v121_v48 }
  0x44   :  { %130 = vst [vmem:[#allocation8 + $0x30] sm:$0xff] %v122_v49  ;;  %131 = vst [vmem:[#allocation8 + $0x38] sm:$0xff] %v123_v50 }
  0x45   :  { %229 = shalt.err (!%p226_p0)
}
  0x46   :  { %s230_s23 = scalar_lea.hbm %s321_s3, 1024 }
  0x47   :  { %p231_p1 = scmp.ne.s32.totalorder %s321_s3, %s230_s23  ;;  %p234_p2 = scmp.lt.u32.totalorder %s230_s23, %s321_s3 }
  0x49   :  { %p236_p3 = pnand %p234_p2, %p231_p1 }
  0x4b   :  { %239 = shalt.err (!%p236_p3)
}
  0x4c   :  { %141 = dma.vmem_to_hbm [thread:$0]  %s139_s19, 1024, %s321_s3, [#allocation4]  }
  0x4d   :  { %244 = dma.done.wait [#allocation4], 1024  }
  0x4e   :  { %245 = vsyncadd [#allocation4], 4294966272 }
  0x4f   :  { %145 = vsyncpa [#allocation3], 1 }
  0x50   :  { %146 = vsyncpa [#allocation6], 1 }
  0x51   :  { %147 = vsyncpa [#allocation4], 1 }

</bundles_post_ra>
